<compile_context>
chip_gen: v7x
topology: tpu7x:2x2x1
jax: 0.10.0
libtpu: 0.0.40
codegen_flags: <defaults>
</compile_context>

<pallas_src>
import functools

import jax
import jax.numpy as jnp
from jax.experimental import pallas as pl
from jax.experimental.pallas import tpu as pltpu


def _round_up(v, m):
    return -(-v // m) * m


def _padded_bytes(rows, cols, dtype):
    """Bytes of a (rows, cols) VMEM tile after (sublane, lane) padding."""
    item = jnp.dtype(dtype).itemsize
    sub = 8 * max(1, 4 // item)          # 8 for f32, 16 for bf16, 32 for int8
    return _round_up(rows, sub) * _round_up(cols, 128) * item


def _is_v5e():
    """v5e has no bf16 VALU -> keep the apply path in f32 there."""
    try:
        kind = jax.devices()[0].device_kind.lower()
    except Exception:
        return False
    return ("v5e" in kind) or ("v5 lite" in kind) or ("v5lite" in kind)


def _se_apply_kernel(x_ref, *rest, fuse_residual, apply_relu, use_mxu, apply_dtype):
    if fuse_residual:
        res_ref, wa_ref, b1_ref, wb_ref, b2_ref, o_ref = rest
    else:
        wa_ref, b1_ref, wb_ref, b2_ref, o_ref = rest

    hw = x_ref.shape[0]                   # block is (HW, C), batch dim squeezed

    # --- squeeze: global average pool over spatial (sublane) axis, f32 accum.
    # (cast fused per-vreg into the reduce; no full f32 block is kept live)
    s = jnp.sum(x_ref[...].astype(jnp.float32), axis=0, keepdims=True) * (1.0 / hw)  # (1, C)

    # --- excitation, f32 gate math.
    if use_mxu:
        # Deep stages: MXU is idle in this kernel, so the matvecs are ~free.
        # wa = W1^T (C, Cr), wb = W2^T (Cr, C), b1 (1, Cr), b2 (1, C).
        h = jnp.dot(s, wa_ref[...], preferred_element_type=jnp.float32) + b1_ref[...]   # (1, Cr)
        h = jnp.maximum(h, 0.0)
        g = jnp.dot(h, wb_ref[...], preferred_element_type=jnp.float32) + b2_ref[...]   # (1, C)
    else:
        # Tiny C: VPU broadcast-multiply + cross reduces (no transposes needed).
        # wa = W1 (Cr, C), wb = W2^T (Cr, C), b1 (Cr, 1), b2 (1, C).
        h = jnp.sum(wa_ref[...] * s, axis=1, keepdims=True) + b1_ref[...]               # (Cr, 1)
        h = jnp.maximum(h, 0.0)
        g = jnp.sum(wb_ref[...] * h, axis=0, keepdims=True) + b2_ref[...]               # (1, C)
    g = jax.nn.sigmoid(g).astype(apply_dtype)                                           # (1, C)

    # --- apply: x * se(x) (+ residual) (+ ReLU); x_ref re-read so no f32 copy.
    y = x_ref[...].astype(apply_dtype) * g              # gate broadcast over sublanes
    if fuse_residual:
        y = y + res_ref[...].astype(apply_dtype)
    if apply_relu:
        y = jnp.maximum(y, 0.0)
    o_ref[...] = y.astype(o_ref.dtype)


def se_apply_nhwc(x, w1, b1, w2, b2, residual=None, apply_relu=False,
                  use_mxu=None, apply_dtype=None):
    """SE gating on channels-last input.

    x: (N, H, W, C) f32 or bf16 (streamed in its own dtype)
    w1: (Cr, C); b1: (Cr,); w2: (C, Cr); b2: (C,)   (f32 gate math)
    residual: optional (N, H, W, C), added after the gating (then optional ReLU)
    """
    N, H, W, C = x.shape
    HW = H * W
    Cr = w1.shape[0]
    stream_dtype = x.dtype

    if use_mxu is None:
        use_mxu = C >= 512                      # deep SE stages -> MXU matvecs
    if apply_dtype is None:
        apply_dtype = (jnp.bfloat16
                       if (stream_dtype == jnp.bfloat16 and not _is_v5e())
                       else jnp.float32)

    x_flat = x.reshape(N, HW, C)
    fuse = residual is not None

    # Tiny weights: f32, pre-oriented for the chosen excitation path.
    w1f = jnp.asarray(w1, jnp.float32)
    w2f = jnp.asarray(w2, jnp.float32)
    if use_mxu:
        wa = w1f.T                                            # (C, Cr)
        b1k = jnp.asarray(b1, jnp.float32).reshape(1, Cr)
    else:
        wa = w1f                                              # (Cr, C)
        b1k = jnp.asarray(b1, jnp.float32).reshape(Cr, 1)
    wb = w2f.T                                                # (Cr, C)
    b2k = jnp.asarray(b2, jnp.float32).reshape(1, C)          # lane-dense row

    data_spec = pl.BlockSpec((None, HW, C), lambda n: (n, 0, 0))   # squeezed batch

    in_specs = [data_spec]
    inputs = [x_flat]
    if fuse:
        in_specs.append(pl.BlockSpec((None, HW, C), lambda n: (n, 0, 0)))
        inputs.append(jnp.reshape(residual, (N, HW, C)))
    in_specs += [
        pl.BlockSpec(wa.shape, lambda n: (0, 0)),
        pl.BlockSpec(b1k.shape, lambda n: (0, 0)),
        pl.BlockSpec(wb.shape, lambda n: (0, 0)),
        pl.BlockSpec(b2k.shape, lambda n: (0, 0)),
    ]
    inputs += [wa, b1k, wb, b2k]

    # Honest VMEM budget: double-buffered streamed blocks (x, out, [res]) in the
    # stream dtype, double-buffered resident weights, plus headroom for the f32
    # per-vreg gate pass and Mosaic scratch.  Capped at 48 MiB (v7x headroom).
    blk_bytes = _padded_bytes(HW, C, stream_dtype)
    n_streams = 3 if fuse else 2
    w_bytes = sum(_padded_bytes(a.shape[0], a.shape[1], jnp.float32)
                  for a in (wa, b1k, wb, b2k))
    headroom = _padded_bytes(HW, C, jnp.float32) + (2 << 20)
    vmem_limit = n_streams * 2 * blk_bytes + 2 * w_bytes + headroom
    vmem_limit = int(min(max(vmem_limit, 16 << 20), 48 << 20))

    out_flat = pl.pallas_call(
        functools.partial(_se_apply_kernel, fuse_residual=fuse,
                          apply_relu=apply_relu, use_mxu=use_mxu,
                          apply_dtype=apply_dtype),
        out_shape=jax.ShapeDtypeStruct((N, HW, C), stream_dtype),
        grid_spec=pltpu.PrefetchScalarGridSpec(
            num_scalar_prefetch=0,
            grid=(N,),
            in_specs=in_specs,
            out_specs=pl.BlockSpec((None, HW, C), lambda n: (n, 0, 0)),
        ),
        compiler_params=pltpu.CompilerParams(
            dimension_semantics=("parallel",),   # batch across TCs when N >= 2
            vmem_limit_bytes=vmem_limit,
        ),
    )(*inputs)

    return out_flat.reshape(N, H, W, C)


def se_apply(x_nchw, w1, b1, w2, b2, residual=None, apply_relu=False, **kwargs):
    """PyTorch-layout (NCHW) convenience wrapper around the NHWC kernel.

    The NCHW<->NHWC transposes here are expected to be free when the
    surrounding convs already run channels-last on TPU.
    """
    x_nhwc = jnp.transpose(x_nchw, (0, 2, 3, 1))
    res_nhwc = None if residual is None else jnp.transpose(residual, (0, 2, 3, 1))
    y = se_apply_nhwc(x_nhwc, w1, b1, w2, b2, residual=res_nhwc,
                      apply_relu=apply_relu, **kwargs)
    return jnp.transpose(y, (0, 3, 1, 2))


def se_apply_ref(x, w1, b1, w2, b2, residual=None, apply_relu=False):
    # pure-JAX reference (f32 math, cast back to x.dtype), NCHW layout.
    xf = x.astype(jnp.float32)
    s = jnp.mean(xf, axis=(2, 3))                                     # (N, C)
    h = jnp.maximum(s @ w1.T.astype(jnp.float32) + b1.astype(jnp.float32), 0.0)
    g = jax.nn.sigmoid(h @ w2.T.astype(jnp.float32) + b2.astype(jnp.float32))
    y = xf * g[:, :, None, None]
    if residual is not None:
        y = y + residual.astype(jnp.float32)
    if apply_relu:
        y = jnp.maximum(y, 0.0)
    return y.astype(x.dtype)


if __name__ == "__main__":
    key = jax.random.PRNGKey(0)

    def make(N, C, H, W, Cr, dtype):
        ks = jax.random.split(key, 6)
        x = jax.random.normal(ks[0], (N, C, H, W), dtype=jnp.float32).astype(dtype)
        r = jax.random.normal(ks[1], (N, C, H, W), dtype=jnp.float32).astype(dtype)
        w1 = jax.random.normal(ks[2], (Cr, C), dtype=jnp.float32) * 0.1
        b1 = jax.random.normal(ks[3], (Cr,), dtype=jnp.float32) * 0.1
        w2 = jax.random.normal(ks[4], (C, Cr), dtype=jnp.float32) * 0.1
        b2 = jax.random.normal(ks[5], (C,), dtype=jnp.float32) * 0.1
        return x, r, w1, b1, w2, b2

    # 1) f32 stream, plain SE gating, VPU excitation path (tiny C).
    x, r, w1, b1, w2, b2 = make(2, 4, 16, 16, 2, jnp.float32)
    out = jax.block_until_ready(se_apply(x, w1, b1, w2, b2))
    ref = se_apply_ref(x, w1, b1, w2, b2)
    assert out.shape == x.shape and out.dtype == x.dtype
    assert jnp.allclose(out, ref, atol=2e-5, rtol=2e-5), "f32 mismatch vs reference"

    # 2) bf16 stream, fused residual add + ReLU, VPU excitation path.
    x, r, w1, b1, w2, b2 = make(2, 128, 8, 8, 8, jnp.bfloat16)
    out = jax.block_until_ready(
        se_apply(x, w1, b1, w2, b2, residual=r, apply_relu=True))
    ref = se_apply_ref(x, w1, b1, w2, b2, residual=r, apply_relu=True)
    assert out.dtype == jnp.bfloat16
    assert jnp.allclose(out.astype(jnp.float32), ref.astype(jnp.float32),
                        atol=5e-2, rtol=5e-2), "bf16 (VPU path) mismatch vs reference"

    # 3) bf16 stream, fused residual + ReLU, MXU excitation path (deep-stage shape).
    x, r, w1, b1, w2, b2 = make(2, 256, 8, 8, 128, jnp.bfloat16)
    out = jax.block_until_ready(
        se_apply(x, w1, b1, w2, b2, residual=r, apply_relu=True, use_mxu=True))
    ref = se_apply_ref(x, w1, b1, w2, b2, residual=r, apply_relu=True)
    assert out.dtype == jnp.bfloat16
    assert jnp.allclose(out.astype(jnp.float32), ref.astype(jnp.float32),
                        atol=5e-2, rtol=5e-2), "bf16 (MXU path) mismatch vs reference"

    print("KERNEL_OK")
</pallas_src>

<mosaic_0001>
module attributes {stable_mosaic.version = 11 : i64} {
  func.func @_se_apply_kernel(%arg0: i32, %arg1: memref<1x256x4xf32, #tpu.memory_space<vmem>>, %arg2: memref<2x4xf32, #tpu.memory_space<vmem>>, %arg3: memref<2x1xf32, #tpu.memory_space<vmem>>, %arg4: memref<2x4xf32, #tpu.memory_space<vmem>>, %arg5: memref<1x4xf32, #tpu.memory_space<vmem>>, %arg6: memref<1x256x4xf32, #tpu.memory_space<vmem>>) attributes {dimension_semantics = [#tpu.dimension_semantics<parallel>], iteration_bounds = array<i64: 2>, scalar_prefetch = 0 : i64, scratch_operands = 0 : i64, tpu.core_type = #tpu.core_type<tc>, window_params = [{transform_indices = @transform_0, window_bounds = array<i64: 1, 256, 4>}, {pipeline_mode = #tpu.pipeline_mode<synchronous>, transform_indices = @transform_1, window_bounds = array<i64: 2, 4>}, {pipeline_mode = #tpu.pipeline_mode<synchronous>, transform_indices = @transform_2, window_bounds = array<i64: 2, 1>}, {pipeline_mode = #tpu.pipeline_mode<synchronous>, transform_indices = @transform_3, window_bounds = array<i64: 2, 4>}, {pipeline_mode = #tpu.pipeline_mode<synchronous>, transform_indices = @transform_4, window_bounds = array<i64: 1, 4>}, {transform_indices = @transform_5, window_bounds = array<i64: 1, 256, 4>}]} {
    %c0 = arith.constant 0 : index
    %c0_0 = arith.constant 0 : index
    %c0_1 = arith.constant 0 : index
    %0 = vector.load %arg1[%c0, %c0_0, %c0_1] : memref<1x256x4xf32, #tpu.memory_space<vmem>>, vector<1x256x4xf32>
    %1 = vector.shape_cast %0 : vector<1x256x4xf32> to vector<256x4xf32>
    %cst = arith.constant dense<0.000000e+00> : vector<4xf32>
    %2 = vector.multi_reduction <add>, %1, %cst [0] : vector<256x4xf32> to vector<4xf32>
    %3 = vector.shape_cast %2 : vector<4xf32> to vector<1x4xf32>
    %cst_2 = arith.constant 3.906250e-03 : f32
    %4 = vector.broadcast %cst_2 : f32 to vector<1x4xf32>
    %5 = arith.mulf %3, %4 : vector<1x4xf32>
    %c0_3 = arith.constant 0 : index
    %c0_4 = arith.constant 0 : index
    %6 = vector.load %arg2[%c0_3, %c0_4] : memref<2x4xf32, #tpu.memory_space<vmem>>, vector<2x4xf32>
    %7 = vector.broadcast %5 : vector<1x4xf32> to vector<2x4xf32>
    %8 = arith.mulf %6, %7 : vector<2x4xf32>
    %cst_5 = arith.constant dense<0.000000e+00> : vector<2xf32>
    %9 = vector.multi_reduction <add>, %8, %cst_5 [1] : vector<2x4xf32> to vector<2xf32>
    %10 = vector.shape_cast %9 : vector<2xf32> to vector<2x1xf32>
    %c0_6 = arith.constant 0 : index
    %c0_7 = arith.constant 0 : index
    %11 = vector.load %arg3[%c0_6, %c0_7] : memref<2x1xf32, #tpu.memory_space<vmem>>, vector<2x1xf32>
    %12 = arith.addf %10, %11 : vector<2x1xf32>
    %cst_8 = arith.constant 0.000000e+00 : f32
    %13 = vector.broadcast %cst_8 : f32 to vector<2x1xf32>
    %14 = arith.maximumf %12, %13 : vector<2x1xf32>
    %c0_9 = arith.constant 0 : index
    %c0_10 = arith.constant 0 : index
    %15 = vector.load %arg4[%c0_9, %c0_10] : memref<2x4xf32, #tpu.memory_space<vmem>>, vector<2x4xf32>
    %16 = vector.broadcast %14 : vector<2x1xf32> to vector<2x4xf32>
    %17 = arith.mulf %15, %16 : vector<2x4xf32>
    %cst_11 = arith.constant dense<0.000000e+00> : vector<4xf32>
    %18 = vector.multi_reduction <add>, %17, %cst_11 [0] : vector<2x4xf32> to vector<4xf32>
    %19 = vector.shape_cast %18 : vector<4xf32> to vector<1x4xf32>
    %c0_12 = arith.constant 0 : index
    %c0_13 = arith.constant 0 : index
    %20 = vector.load %arg5[%c0_12, %c0_13] : memref<1x4xf32, #tpu.memory_space<vmem>>, vector<1x4xf32>
    %21 = arith.addf %19, %20 : vector<1x4xf32>
    %22 = arith.negf %21 : vector<1x4xf32>
    %23 = math.exp %22 : vector<1x4xf32>
    %cst_14 = arith.constant 1.000000e+00 : f32
    %24 = vector.broadcast %cst_14 : f32 to vector<1x4xf32>
    %25 = arith.addf %24, %23 : vector<1x4xf32>
    %26 = arith.divf %24, %25 : vector<1x4xf32>
    %c0_15 = arith.constant 0 : index
    %c0_16 = arith.constant 0 : index
    %c0_17 = arith.constant 0 : index
    %27 = vector.load %arg1[%c0_15, %c0_16, %c0_17] : memref<1x256x4xf32, #tpu.memory_space<vmem>>, vector<1x256x4xf32>
    %28 = vector.shape_cast %27 : vector<1x256x4xf32> to vector<256x4xf32>
    %29 = vector.broadcast %26 : vector<1x4xf32> to vector<256x4xf32>
    %30 = arith.mulf %28, %29 : vector<256x4xf32>
    %c0_18 = arith.constant 0 : index
    %c0_19 = arith.constant 0 : index
    %c0_20 = arith.constant 0 : index
    %31 = vector.load %arg6[%c0_18, %c0_19, %c0_20] : memref<1x256x4xf32, #tpu.memory_space<vmem>>, vector<1x256x4xf32>
    %32 = vector.shape_cast %31 : vector<1x256x4xf32> to vector<256x4xf32>
    %33 = vector.shape_cast %30 : vector<256x4xf32> to vector<1x256x4xf32>
    tpu.vector_store %arg6[%c0_18, %c0_19, %c0_20], %33 {strides = array<i32>} : memref<1x256x4xf32, #tpu.memory_space<vmem>>, vector<1x256x4xf32>,
    return
  }
  func.func @transform_0(%arg0: i32) -> (i32, i32, i32) {
    %c0_i32 = arith.constant 0 : i32
    %c0_i32_0 = arith.constant 0 : i32
    %c0_i32_1 = arith.constant 0 : i32
    return %arg0, %c0_i32, %c0_i32_0 : i32, i32, i32
  }
  func.func @transform_1(%arg0: i32) -> (i32, i32) {
    %c0_i32 = arith.constant 0 : i32
    %c0_i32_0 = arith.constant 0 : i32
    %c0_i32_1 = arith.constant 0 : i32
    return %c0_i32, %c0_i32_0 : i32, i32
  }
  func.func @transform_2(%arg0: i32) -> (i32, i32) {
    %c0_i32 = arith.constant 0 : i32
    %c0_i32_0 = arith.constant 0 : i32
    %c0_i32_1 = arith.constant 0 : i32
    return %c0_i32, %c0_i32_0 : i32, i32
  }
  func.func @transform_3(%arg0: i32) -> (i32, i32) {
    %c0_i32 = arith.constant 0 : i32
    %c0_i32_0 = arith.constant 0 : i32
    %c0_i32_1 = arith.constant 0 : i32
    return %c0_i32, %c0_i32_0 : i32, i32
  }
  func.func @transform_4(%arg0: i32) -> (i32, i32) {
    %c0_i32 = arith.constant 0 : i32
    %c0_i32_0 = arith.constant 0 : i32
    %c0_i32_1 = arith.constant 0 : i32
    return %c0_i32, %c0_i32_0 : i32, i32
  }
  func.func @transform_5(%arg0: i32) -> (i32, i32, i32) {
    %c0_i32 = arith.constant 0 : i32
    %c0_i32_0 = arith.constant 0 : i32
    %c0_i32_1 = arith.constant 0 : i32
    return %arg0, %c0_i32, %c0_i32_0 : i32, i32, i32
  }
}

</mosaic_0001>

<bundles_post_ra>
// kernel: tpu_custom_call.1
= control target key start
LH: loop header
LB: loop body
LE: loop exit
PB: predicated region body
PF: predicated region fallthrough
CT: control target
= control target key end

     0   :  { %s549_s18 = smov 0   ;;  %s845_s0 = inlined_call_operand.vmem [shape: f32[2,256,4], index: 0, kind: input, shape index: {}]   ;;  %s846_s1 = inlined_call_operand.vmem [shape: f32[2,4], index: 1, kind: input, shape index: {}]   ;;  %s847_s2 = inlined_call_operand.vmem [shape: f32[2,1], index: 2, kind: input, shape index: {}]   ;;  %s848_s3 = inlined_call_operand.vmem [shape: f32[2,4], index: 3, kind: input, shape index: {}]   ;;  %s849_s4 = inlined_call_operand.vmem [shape: f32[1,4], index: 4, kind: input, shape index: {}]   ;;  %s850_s5 = inlined_call_operand.vmem [shape: f32[2,256,4], index: 5, kind: output, shape index: {}]  }
   0x1 LB: > { %s482_s19 = sadd.s32 4294967295, %s516_s18   ;;  %p486_p0 = scmp.ge.s32.totalorder %s516_s18, 1  ;;  %s516_s18 = sphi %s549_s18, %s15_s18  }
   0x2   : > { %p187_p1 = scmp.lt.s32.totalorder %s516_s18, 3 }
   0x4   : > { %p188_p2 = pnand %p486_p0, %p187_p1 }
   0x5   : > { %p215_p3 = scmp.lt.s32.totalorder (!%p188_p2), %s482_s19, 1  ;;  %vm257_vm0 = vcmask (!%p188_p2), 31744   ;;  %vm330_vm1 = vcmask (!%p188_p2), 25600  }
   0x6   : > { %191 = sbr.rel (%p188_p2) target bundleno = 435 (0x1b3), region = 40 }
   0xd   : > { %s852_s19 = smov (!%p215_p3, %s482_s19), 1 }
   0xe   : > { %s494_s20 = sshll.u32 %s852_s19, 8 }
   0xf   : > { %s565_s23 = scalar_lea.vmem %s845_s0, %s494_s20  ;;  %s744_s9 = scalar_lea.vmem %s850_s5, %s494_s20 }
  0x10   : > { %v568_v0 = vld [vmem:[%s565_s23] sm:$0xff]  ;;  %v571_v1 = vld [vmem:[%s565_s23 + $0x8] sm:$0xff]  ;;  %v574_v2 = vld [vmem:[%s565_s23 + $0x10] sm:$0xff] }
  0x11   : > { %v577_v3 = vld [vmem:[%s565_s23 + $0x18] sm:$0xff]  ;;  %v258_v4 = vsel %vm257_vm0, %v568_v0, 0.0  ;;  %v259_v5 = vsel %vm257_vm0, %v571_v1, 0.0  ;;  %v261_v6 = vsel %vm257_vm0, %v574_v2, 0.0  ;;  %v586_v7 = vld [vmem:[%s565_s23 + $0x20] sm:$0xff]  ;;  %v591_v10 = vld [vmem:[%s565_s23 + $0x28] sm:$0xff] }
  0x12   : > { %v260_v8 = vadd.f32 %v259_v5, %v258_v4  ;;  %v263_v9 = vsel %vm257_vm0, %v577_v3, 0.0  ;;  %v265_v12 = vsel %vm257_vm0, %v586_v7, 0.0  ;;  %v596_v13 = vld [vmem:[%s565_s23 + $0x30] sm:$0xff]  ;;  %v267_v15 = vsel %vm257_vm0, %v591_v10, 0.0  ;;  %v601_v16 = vld [vmem:[%s565_s23 + $0x38] sm:$0xff]  ;;  %v606_v19 = vld [vmem:[%s565_s23 + $0x40] sm:$0xff] }
  0x13   : > { %v269_v18 = vsel %vm257_vm0, %v596_v13, 0.0  ;;  %v271_v21 = vsel %vm257_vm0, %v601_v16, 0.0  ;;  %v611_v22 = vld [vmem:[%s565_s23 + $0x48] sm:$0xff]  ;;  %v273_v24 = vsel %vm257_vm0, %v606_v19, 0.0  ;;  %v616_v25 = vld [vmem:[%s565_s23 + $0x50] sm:$0xff]  ;;  %v621_v28 = vld [vmem:[%s565_s23 + $0x58] sm:$0xff] }
  0x14   : > { %v262_v11 = vadd.f32 %v261_v6, %v260_v8  ;;  %v275_v27 = vsel %vm257_vm0, %v611_v22, 0.0  ;;  %v277_v30 = vsel %vm257_vm0, %v616_v25, 0.0  ;;  %v626_v31 = vld [vmem:[%s565_s23 + $0x60] sm:$0xff]  ;;  %v279_v33 = vsel %vm257_vm0, %v621_v28, 0.0  ;;  %v631_v34 = vld [vmem:[%s565_s23 + $0x68] sm:$0xff]  ;;  %v636_v37 = vld [vmem:[%s565_s23 + $0x70] sm:$0xff] }
  0x15   : > { %v281_v36 = vsel %vm257_vm0, %v626_v31, 0.0  ;;  %v283_v39 = vsel %vm257_vm0, %v631_v34, 0.0  ;;  %v641_v40 = vld [vmem:[%s565_s23 + $0x78] sm:$0xff]  ;;  %v285_v42 = vsel %vm257_vm0, %v636_v37, 0.0  ;;  %v646_v43 = vld [vmem:[%s565_s23 + $0x80] sm:$0xff]  ;;  %v651_v46 = vld [vmem:[%s565_s23 + $0x88] sm:$0xff] }
  0x16   : > { %v264_v14 = vadd.f32 %v263_v9, %v262_v11  ;;  %v287_v45 = vsel %vm257_vm0, %v641_v40, 0.0  ;;  %v289_v48 = vsel %vm257_vm0, %v646_v43, 0.0  ;;  %v656_v49 = vld [vmem:[%s565_s23 + $0x90] sm:$0xff]  ;;  %v291_v51 = vsel %vm257_vm0, %v651_v46, 0.0  ;;  %v661_v52 = vld [vmem:[%s565_s23 + $0x98] sm:$0xff]  ;;  %v666_v55 = vld [vmem:[%s565_s23 + $0xa0] sm:$0xff] }
  0x17   : > { %v293_v54 = vsel %vm257_vm0, %v656_v49, 0.0  ;;  %v295_v57 = vsel %vm257_vm0, %v661_v52, 0.0  ;;  %v671_v58 = vld [vmem:[%s565_s23 + $0xa8] sm:$0xff]  ;;  %v297_v60 = vsel %vm257_vm0, %v666_v55, 0.0  ;;  %v676_v61 = vld [vmem:[%s565_s23 + $0xb0] sm:$0xff]  ;;  %v681_v4 = vld [vmem:[%s565_s23 + $0xb8] sm:$0xff] }
  0x18   : > { %v266_v17 = vadd.f32 %v265_v12, %v264_v14  ;;  %v299_v63 = vsel %vm257_vm0, %v671_v58, 0.0  ;;  %v301_v6 = vsel %vm257_vm0, %v676_v61, 0.0  ;;  %v686_v8 = vld [vmem:[%s565_s23 + $0xc0] sm:$0xff]  ;;  %v303_v11 = vsel %vm257_vm0, %v681_v4, 0.0  ;;  %v691_v12 = vld [vmem:[%s565_s23 + $0xc8] sm:$0xff] }
  0x1a   : > { %v268_v20 = vadd.f32 %v267_v15, %v266_v17  ;;  %v305_v15 = vsel %vm257_vm0, %v686_v8, 0.0  ;;  %v696_v17 = vld [vmem:[%s565_s23 + $0xd0] sm:$0xff] }
  0x1c   : > { %v270_v23 = vadd.f32 %v269_v18, %v268_v20  ;;  %v307_v20 = vsel %vm257_vm0, %v691_v12, 0.0 }
  0x1e   : > { %v272_v26 = vadd.f32 %v271_v21, %v270_v23  ;;  %v701_v21 = vld [vmem:[%s565_s23 + $0xd8] sm:$0xff] }
  0x20   : > { %v274_v29 = vadd.f32 %v273_v24, %v272_v26  ;;  %v309_v24 = vsel %vm257_vm0, %v696_v17, 0.0  ;;  %v706_v26 = vld [vmem:[%s565_s23 + $0xe0] sm:$0xff] }
  0x22   : > { %v276_v32 = vadd.f32 %v275_v27, %v274_v29  ;;  %v311_v29 = vsel %vm257_vm0, %v701_v21, 0.0 }
  0x24   : > { %v278_v35 = vadd.f32 %v277_v30, %v276_v32  ;;  %v711_v30 = vld [vmem:[%s565_s23 + $0xe8] sm:$0xff] }
  0x26   : > { %v280_v38 = vadd.f32 %v279_v33, %v278_v35  ;;  %v313_v33 = vsel %vm257_vm0, %v706_v26, 0.0  ;;  %v716_v35 = vld [vmem:[%s565_s23 + $0xf0] sm:$0xff] }
  0x28   : > { %v282_v41 = vadd.f32 %v281_v36, %v280_v38  ;;  %v315_v38 = vsel %vm257_vm0, %v711_v30, 0.0 }
  0x2a   : > { %v284_v44 = vadd.f32 %v283_v39, %v282_v41  ;;  %v721_v39 = vld [vmem:[%s565_s23 + $0xf8] sm:$0xff] }
  0x2c   : > { %v286_v47 = vadd.f32 %v285_v42, %v284_v44  ;;  %v317_v42 = vsel %vm257_vm0, %v716_v35, 0.0 }
  0x2e   : > { %v288_v50 = vadd.f32 %v287_v45, %v286_v47  ;;  %v319_v45 = vsel %vm257_vm0, %v721_v39, 0.0 }
  0x30   : > { %v290_v53 = vadd.f32 %v289_v48, %v288_v50 }
  0x32   : > { %v292_v56 = vadd.f32 %v291_v51, %v290_v53 }
  0x34   : > { %v294_v59 = vadd.f32 %v293_v54, %v292_v56 }
  0x36   : > { %v296_v62 = vadd.f32 %v295_v57, %v294_v59  ;;  %v328_v59 = vld [vmem:[%s846_s1] sm:$0x3] }
  0x38   : > { %v298_v5 = vadd.f32 %v297_v60, %v296_v62 }
  0x3a   : > { %v300_v9 = vadd.f32 %v299_v63, %v298_v5  ;;  %v518_v5 = vmov 0  }
  0x3b   : > { %505 = vset.pattern.permute.xlu0 %v518_v5 }
  0x3c   : > { %v302_v14 = vadd.f32 %v301_v6, %v300_v9  ;;  %v334_v6 = vld [vmem:[%s847_s2] sm:$0x3] }
  0x3e   : > { %v304_v18 = vadd.f32 %v303_v11, %v302_v14 }
  0x40   : > { %v306_v23 = vadd.f32 %v305_v15, %v304_v18  ;;  %v337_v15 = vld [vmem:[%s848_s3] sm:$0x3] }
  0x42   : > { %v308_v27 = vadd.f32 %v307_v20, %v306_v23 }
  0x44   : > { %v310_v32 = vadd.f32 %v309_v24, %v308_v27 }
  0x46   : > { %v312_v36 = vadd.f32 %v311_v29, %v310_v32 }
  0x48   : > { %v314_v41 = vadd.f32 %v313_v33, %v312_v36  ;;  %v351_v36 = vld [vmem:[%s849_s4] sm:$0x1] }
  0x4a   : > { %v316_v44 = vadd.f32 %v315_v38, %v314_v41 }
  0x4c   : > { %v318_v47 = vadd.f32 %v317_v42, %v316_v44 }
  0x4e   : > { %v320_v48 = vadd.f32 %v319_v45, %v318_v47  ;;  %v359_v47 = vlaneseq }
  0x50   : > { %v321_v50 = vrot.slane %v320_v48, 4 }
  0x52   : > { %v322_v51 = vadd.f32 %v321_v50, %v320_v48  ;;  %v360_v48 = vshrl.u32 %v359_v47, 7 }
  0x54   : > { %v323_v53 = vrot.slane %v322_v51, 2  ;;  %v361_v50 = vsub.s32 0, %v360_v48 }
  0x56   : > { %v324_v54 = vadd.f32 %v323_v53, %v322_v51 }
  0x58   : > { %v325_v56 = vrot.slane %v324_v54, 1 }
  0x5a   : > { %v326_v57 = vadd.f32 %v325_v56, %v324_v54 }
  0x5c   : > { %v327_v60 = vmul.f32 0.00390625, %v326_v57 }
  0x5e   : > { %v329_v62 = vmul.f32 %v328_v59, %v327_v60 }
  0x60   : > { %v331_v63 = vsel %vm330_vm1, %v329_v62, 0.0 }
  0x61   : > { %332 = vadd.xlane.f32.xlu0 %v331_v63 }
  0xee   : > { %v333_v9 = vpop.xlane.xlu0 %332 }
  0xef   : > { %v335_v11 = vadd.f32 %v334_v6, %v333_v9 }
  0xf1   : > { %v336_v14 = vmax.f32 %v335_v11, 0.0 }
  0xf3   : > { %340 = vperm.xlu0 %505, %v336_v14  }
 0x172   : > { %v341_v18 = vpop.permute.xlu0 %340 }
 0x173   : > { %v343_v20 = vmul.f32 %v341_v18, %v337_v15 }
 0x175   : > { %v344_v23 = vsel %vm330_vm1, %v343_v20, 0.0 }
 0x176   : > { %v345_v24 = vrot.slane %v344_v23, 4 }
 0x178   : > { %v346_v27 = vadd.f32 %v345_v24, %v344_v23 }
 0x17a   : > { %v347_v29 = vrot.slane %v346_v27, 2 }
 0x17c   : > { %v348_v32 = vadd.f32 %v347_v29, %v346_v27 }
 0x17e   : > { %v349_v33 = vrot.slane %v348_v32, 1 }
 0x180   : > { %v350_v38 = vadd.f32 %v349_v33, %v348_v32 }
 0x182   : > { %v352_v41 = vadd.f32 %v351_v36, %v350_v38 }
 0x184   : > { %v491_v42 = vmul.f32 -1.442695, %v352_v41 }
 0x186   : > { %506 = vpow2.f32 %v491_v42 }
 0x190   : > { %v507_v44 = vpop.eup %506 }
 0x191   : > { %v356_v45 = vadd.f32 1.0, %v507_v44 }
 0x193   : > { %508 = vrcp.f32 %v356_v45 }
 0x19d   : > { %v509_v51 = vpop.eup %508 }
 0x19e   : > { %v362_v53 = vrot.slane %v509_v51, %v361_v50 }
 0x1a0   : > { %v363_v54 = vmul.f32 %v362_v53, %v568_v0  ;;  %v364_v56 = vmul.f32 %v362_v53, %v571_v1  ;;  %v365_v57 = vmul.f32 %v362_v53, %v574_v2  ;;  %v366_v59 = vmul.f32 %v362_v53, %v577_v3 }
 0x1a1   : > { %v367_v60 = vmul.f32 %v362_v53, %v586_v7  ;;  %v368_v62 = vmul.f32 %v362_v53, %v591_v10  ;;  %v369_v63 = vmul.f32 %v362_v53, %v596_v13  ;;  %v370_v5 = vmul.f32 %v362_v53, %v601_v16 }
 0x1a2   : > { %v371_v0 = vmul.f32 %v362_v53, %v606_v19  ;;  %v372_v1 = vmul.f32 %v362_v53, %v611_v22  ;;  %v373_v2 = vmul.f32 %v362_v53, %v616_v25  ;;  %v374_v3 = vmul.f32 %v362_v53, %v621_v28  ;;  %395 = vst.msk [vmem:[%s744_s9] sm:$0xff] %vm257_vm0, %v363_v54 }
 0x1a3   : > { %396 = vst.msk [vmem:[%s744_s9 + $0x8] sm:$0xff] %vm257_vm0, %v364_v56  ;;  %397 = vst.msk [vmem:[%s744_s9 + $0x10] sm:$0xff] %vm257_vm0, %v365_v57  ;;  %v375_v7 = vmul.f32 %v362_v53, %v626_v31  ;;  %v376_v10 = vmul.f32 %v362_v53, %v631_v34  ;;  %v377_v13 = vmul.f32 %v362_v53, %v636_v37 }
 0x1a4   : > { %398 = vst.msk [vmem:[%s744_s9 + $0x18] sm:$0xff] %vm257_vm0, %v366_v59  ;;  %v378_v16 = vmul.f32 %v362_v53, %v641_v40  ;;  %399 = vst.msk [vmem:[%s744_s9 + $0x20] sm:$0xff] %vm257_vm0, %v367_v60  ;;  %v379_v19 = vmul.f32 %v362_v53, %v646_v43  ;;  %v380_v22 = vmul.f32 %v362_v53, %v651_v46 }
 0x1a5   : > { %400 = vst.msk [vmem:[%s744_s9 + $0x28] sm:$0xff] %vm257_vm0, %v368_v62  ;;  %401 = vst.msk [vmem:[%s744_s9 + $0x30] sm:$0xff] %vm257_vm0, %v369_v63  ;;  %v381_v25 = vmul.f32 %v362_v53, %v656_v49  ;;  %v382_v28 = vmul.f32 %v362_v53, %v661_v52  ;;  %v383_v31 = vmul.f32 %v362_v53, %v666_v55 }
 0x1a6   : > { %402 = vst.msk [vmem:[%s744_s9 + $0x38] sm:$0xff] %vm257_vm0, %v370_v5  ;;  %403 = vst.msk [vmem:[%s744_s9 + $0x40] sm:$0xff] %vm257_vm0, %v371_v0  ;;  %v384_v34 = vmul.f32 %v362_v53, %v671_v58  ;;  %v385_v37 = vmul.f32 %v362_v53, %v676_v61  ;;  %v386_v40 = vmul.f32 %v362_v53, %v681_v4 }
 0x1a7   : > { %404 = vst.msk [vmem:[%s744_s9 + $0x48] sm:$0xff] %vm257_vm0, %v372_v1  ;;  %405 = vst.msk [vmem:[%s744_s9 + $0x50] sm:$0xff] %vm257_vm0, %v373_v2  ;;  %v387_v43 = vmul.f32 %v362_v53, %v686_v8  ;;  %v388_v46 = vmul.f32 %v362_v53, %v691_v12  ;;  %v389_v49 = vmul.f32 %v362_v53, %v696_v17 }
 0x1a8   : > { %406 = vst.msk [vmem:[%s744_s9 + $0x58] sm:$0xff] %vm257_vm0, %v374_v3  ;;  %407 = vst.msk [vmem:[%s744_s9 + $0x60] sm:$0xff] %vm257_vm0, %v375_v7  ;;  %v390_v52 = vmul.f32 %v362_v53, %v701_v21  ;;  %v391_v55 = vmul.f32 %v362_v53, %v706_v26  ;;  %v392_v58 = vmul.f32 %v362_v53, %v711_v30 }
 0x1a9   : > { %408 = vst.msk [vmem:[%s744_s9 + $0x68] sm:$0xff] %vm257_vm0, %v376_v10  ;;  %409 = vst.msk [vmem:[%s744_s9 + $0x70] sm:$0xff] %vm257_vm0, %v377_v13  ;;  %v393_v61 = vmul.f32 %v362_v53, %v716_v35  ;;  %v394_v4 = vmul.f32 %v362_v53, %v721_v39 }
 0x1aa   : > { %410 = vst.msk [vmem:[%s744_s9 + $0x78] sm:$0xff] %vm257_vm0, %v378_v16  ;;  %411 = vst.msk [vmem:[%s744_s9 + $0x80] sm:$0xff] %vm257_vm0, %v379_v19 }
 0x1ab   : > { %412 = vst.msk [vmem:[%s744_s9 + $0x88] sm:$0xff] %vm257_vm0, %v380_v22  ;;  %413 = vst.msk [vmem:[%s744_s9 + $0x90] sm:$0xff] %vm257_vm0, %v381_v25 }
 0x1ac   : > { %414 = vst.msk [vmem:[%s744_s9 + $0x98] sm:$0xff] %vm257_vm0, %v382_v28  ;;  %415 = vst.msk [vmem:[%s744_s9 + $0xa0] sm:$0xff] %vm257_vm0, %v383_v31 }
 0x1ad   : > { %416 = vst.msk [vmem:[%s744_s9 + $0xa8] sm:$0xff] %vm257_vm0, %v384_v34  ;;  %417 = vst.msk [vmem:[%s744_s9 + $0xb0] sm:$0xff] %vm257_vm0, %v385_v37 }
 0x1ae   : > { %418 = vst.msk [vmem:[%s744_s9 + $0xb8] sm:$0xff] %vm257_vm0, %v386_v40  ;;  %419 = vst.msk [vmem:[%s744_s9 + $0xc0] sm:$0xff] %vm257_vm0, %v387_v43 }
 0x1af   : > { %420 = vst.msk [vmem:[%s744_s9 + $0xc8] sm:$0xff] %vm257_vm0, %v388_v46  ;;  %421 = vst.msk [vmem:[%s744_s9 + $0xd0] sm:$0xff] %vm257_vm0, %v389_v49 }
 0x1b0   : > { %422 = vst.msk [vmem:[%s744_s9 + $0xd8] sm:$0xff] %vm257_vm0, %v390_v52  ;;  %423 = vst.msk [vmem:[%s744_s9 + $0xe0] sm:$0xff] %vm257_vm0, %v391_v55 }
 0x1b1   : > { %424 = vst.msk [vmem:[%s744_s9 + $0xe8] sm:$0xff] %vm257_vm0, %v392_v58  ;;  %425 = vst.msk [vmem:[%s744_s9 + $0xf0] sm:$0xff] %vm257_vm0, %v393_v61 }
 0x1b2   : > { %426 = vst.msk [vmem:[%s744_s9 + $0xf8] sm:$0xff] %vm257_vm0, %v394_v4 }
 0x1b3 PF: > { %s15_s18 = sadd.s32 1, %s516_s18  }
 0x1b4   : > { %p12_p4 = scmp.ge.s32.totalorder %s15_s18, 4  }
 0x1b6   :  { %14 = sbr.rel (!%p12_p4) target bundleno = 1 (0x1), region = 70 }

</bundles_post_ra>
